<compile_context>
chip_gen: v7x
topology: tpu7x:2x2x1
jax: 0.10.0
libtpu: 0.0.40
codegen_flags: <defaults>
</compile_context>

<pallas_src>
import jax
import jax.numpy as jnp
from jax.experimental import pallas as pl
from jax.experimental.pallas import tpu as pltpu


# ---------------------------------------------------------------------------
# Pallas kernel
# ---------------------------------------------------------------------------

def _identity_copy_kernel(x_ref, o_ref):
    # Straight tile copy; lowers to full-width vld/vst on lane-dense blocks.
    o_ref[...] = x_ref[...]


# ---------------------------------------------------------------------------
# Wrapper
# ---------------------------------------------------------------------------

_LANES = 128


def silence_forward(x, *, max_tile_rows: int = 1024):
    """Identity forward pass (PyTorch `Silence`) via a tiled Pallas copy."""
    orig_shape = x.shape
    orig_dtype = x.dtype

    flat = x.reshape(-1)
    n = flat.shape[0]

    # Lay the data out lane-dense: (rows, 128).
    rows = pl.cdiv(n, _LANES)
    # Tile height: multiple of 8 (sublanes), capped at max_tile_rows.
    tile_rows = min(max_tile_rows, ((rows + 7) // 8) * 8)
    rows_padded = ((rows + tile_rows - 1) // tile_rows) * tile_rows

    pad = rows_padded * _LANES - n
    if pad:
        flat = jnp.pad(flat, (0, pad))
    x2d = flat.reshape(rows_padded, _LANES)

    grid = (rows_padded // tile_rows,)

    out2d = pl.pallas_call(
        _identity_copy_kernel,
        out_shape=jax.ShapeDtypeStruct((rows_padded, _LANES), orig_dtype),
        grid=grid,
        in_specs=[pl.BlockSpec((tile_rows, _LANES), lambda i: (i, 0))],
        out_specs=pl.BlockSpec((tile_rows, _LANES), lambda i: (i, 0)),
        compiler_params=pltpu.CompilerParams(
            dimension_semantics=("parallel",),
        ),
    )(x2d)

    return out2d.reshape(-1)[:n].reshape(orig_shape)


# ---------------------------------------------------------------------------
# Test
# ---------------------------------------------------------------------------

if __name__ == "__main__":
    key = jax.random.PRNGKey(0)
    x = jax.random.normal(key, (2, 4, 16, 16), jnp.float32)

    fwd = jax.jit(silence_forward)
    out = jax.block_until_ready(fwd(x))

    assert out.shape == x.shape, (out.shape, x.shape)
    assert out.dtype == x.dtype, (out.dtype, x.dtype)
    err = float(jnp.max(jnp.abs(out - x)))
    assert err == 0.0, f"identity mismatch, max abs error = {err}"

    # Also exercise a non-128-aligned / non-f32 shape to validate padding path.
    xb = jax.random.normal(jax.random.PRNGKey(1), (3, 5, 7), jnp.bfloat16)
    ob = jax.block_until_ready(silence_forward(xb))
    assert ob.shape == xb.shape and ob.dtype == xb.dtype
    assert bool(jnp.all(ob == xb))

    print("KERNEL_OK")
</pallas_src>

<mosaic_0001>
module attributes {stable_mosaic.version = 11 : i64} {
  func.func @_identity_copy_kernel(%arg0: i32, %arg1: memref<16x128xf32, #tpu.memory_space<vmem>>, %arg2: memref<16x128xf32, #tpu.memory_space<vmem>>) attributes {dimension_semantics = [#tpu.dimension_semantics<parallel>], iteration_bounds = array<i64: 1>, scalar_prefetch = 0 : i64, scratch_operands = 0 : i64, tpu.core_type = #tpu.core_type<tc>, window_params = [{transform_indices = @transform_0, window_bounds = array<i64: 16, 128>}, {transform_indices = @transform_1, window_bounds = array<i64: 16, 128>}]} {
    %c0 = arith.constant 0 : index
    %c0_0 = arith.constant 0 : index
    %0 = vector.load %arg1[%c0, %c0_0] : memref<16x128xf32, #tpu.memory_space<vmem>>, vector<16x128xf32>
    %c0_1 = arith.constant 0 : index
    %c0_2 = arith.constant 0 : index
    %1 = vector.load %arg2[%c0_1, %c0_2] : memref<16x128xf32, #tpu.memory_space<vmem>>, vector<16x128xf32>
    tpu.vector_store %arg2[%c0_1, %c0_2], %0 {strides = array<i32>} : memref<16x128xf32, #tpu.memory_space<vmem>>, vector<16x128xf32>,
    return
  }
  func.func @transform_0(%arg0: i32) -> (i32, i32) {
    %c0_i32 = arith.constant 0 : i32
    %c0_i32_0 = arith.constant 0 : i32
    return %arg0, %c0_i32 : i32, i32
  }
  func.func @transform_1(%arg0: i32) -> (i32, i32) {
    %c0_i32 = arith.constant 0 : i32
    %c0_i32_0 = arith.constant 0 : i32
    return %arg0, %c0_i32 : i32, i32
  }
}

</mosaic_0001>

<bundles_post_ra>
// kernel: silence_forward.1
= control target key start
LH: loop header
LB: loop body
LE: loop exit
PB: predicated region body
PF: predicated region fallthrough
CT: control target
= control target key end

     0   :  { %s38_s0 = inlined_call_operand.vmem [shape: f32[16,128], index: 0, kind: input, shape index: {}]   ;;  %s39_s1 = inlined_call_operand.vmem [shape: f32[16,128], index: 1, kind: output, shape index: {}]  }
   0x1   :  { %v8_v0 = vld [vmem:[%s38_s0] sm:$0xff]  ;;  %v9_v1 = vld [vmem:[%s38_s0 + $0x8] sm:$0xff] }
   0x2   :  { %10 = vst [vmem:[%s39_s1] sm:$0xff] %v8_v0  ;;  %11 = vst [vmem:[%s39_s1 + $0x8] sm:$0xff] %v9_v1 }

</bundles_post_ra>
